<compile_context>
chip_gen: v6e
topology: v6e:2x2x1
jax: 0.10.0
libtpu: 0.0.40
codegen_flags: <defaults>
</compile_context>

<pallas_src>
import jax
import jax.numpy as jnp
from jax.experimental import pallas as pl
from jax.experimental.pallas import tpu as pltpu


def _round_up(x, m):
    return ((x + m - 1) // m) * m


def _cdiv(a, b):
    return (a + b - 1) // b


def _vmem_capacity_bytes():
    """Trace-time VMEM query; conservative (v7x per-TC) fallback."""
    try:
        return int(pltpu.get_tpu_info().vmem_capacity_bytes)
    except Exception:
        return 64 * 1024 * 1024


def _pick_tk(c_in, tk_max=2048):
    """Contraction (C_in) tile: whole C_in when it fits, else a multiple of
    128 that divides C_in exactly (every K block full -> no garbage enters
    the reduction)."""
    if c_in <= tk_max:
        return c_in
    t = (tk_max // 128) * 128
    while t >= 128:
        if c_in % t == 0:
            return t
        t -= 128
    return c_in  # no clean divisor: single (big but correct) K block


def _pick_tm(dim_out):
    """Output-channel tile: whole dim_out when small, else 256 (multiple of 8,
    full MXU M dimension; the partial last block is masked)."""
    return dim_out if dim_out <= 512 else 256


def _pick_tn(hw, tm, tk, itemsize, budget_bytes, want_spatial_splits):
    """Spatial (lane) tile.  Largest multiple of 128 whose per-step VMEM
    footprint fits the budget, then balanced across the spatial blocks and
    (best effort) split so the parallel grid has enough steps for v7x's two
    TensorCores."""
    # Per-step VMEM: double-buffered x/out tiles, double-buffered weight tile,
    # lane-padded f32 bias tile, f32 accumulator scratch.
    per_col = 2 * (tk + tm) * itemsize + tm * 4
    fixed = 2 * tm * tk * itemsize + 2 * _round_up(tm, 8) * 128 * 4
    avail = max(budget_bytes - fixed, 128 * per_col)
    max_tn = max(128, (avail // per_col) // 128 * 128)

    nn = _cdiv(hw, max_tn) if hw > max_tn else 1
    nn = max(nn, want_spatial_splits)      # megacore: something to shard
    nn = min(nn, _cdiv(hw, 128))           # never narrower than 128 lanes
    if nn <= 1:
        return hw                          # one full-width block (== full dim)
    return _round_up(_cdiv(hw, nn), 128)   # balanced, multiple of 128


def _nin_kernel_fused(x_ref, w_ref, b_ref, o_ref):
    # x: (C_in, tn)  w: (tm, C_in)  b: (tm, 1) f32  o: (tm, tn) lane-dense.
    acc = jnp.dot(w_ref[...], x_ref[...], preferred_element_type=jnp.float32)
    o_ref[...] = (acc + b_ref[...]).astype(o_ref.dtype)


def _nin_kernel_acc(x_ref, w_ref, b_ref, o_ref, acc_ref):
    # K-tiled path: f32 accumulator, init at k==0, finalize at k==last.
    k = pl.program_id(3)

    @pl.when(k == 0)
    def _():
        acc_ref[...] = jnp.zeros_like(acc_ref)

    acc_ref[...] += jnp.dot(x_ref[...].T if False else w_ref[...], x_ref[...],
                            preferred_element_type=jnp.float32)

    @pl.when(k == pl.num_programs(3) - 1)
    def _():
        o_ref[...] = (acc_ref[...] + b_ref[...]).astype(o_ref.dtype)


@jax.jit
def nin_forward(x_nchw, v, g, bias):
    """Weight-normalized 1x1 conv (nin.forward), channels-first throughout.

    x_nchw: (B, C_in, H, W);  v: (dim_out, C_in);  g, bias: (dim_out,)
    returns (B, dim_out, H, W)
    """
    B, C_in, H, W = x_nchw.shape
    dim_out = v.shape[0]
    HW = H * W
    itemsize = x_nchw.dtype.itemsize

    # weight_norm (default dim=0 for nn.Linear): w[o,:] = g[o] * v[o,:] / ||v[o,:]||
    # Tiny parameter glue -> plain JAX, f32.
    v_f32 = v.astype(jnp.float32)
    v_norm = jnp.sqrt(jnp.sum(v_f32 * v_f32, axis=1, keepdims=True))
    w_eff = (g[:, None].astype(jnp.float32) * v_f32 / v_norm).astype(x_nchw.dtype)
    b2d = bias.astype(jnp.float32).reshape(dim_out, 1)  # stays f32, added pre-cast

    # Free, contiguous reshape -- no transposes, no extra HBM traffic.
    x3d = x_nchw.reshape(B, C_in, HW)

    vmem_cap = _vmem_capacity_bytes()
    budget = vmem_cap // 3            # ~21 MiB on v7x, ~42 MiB on v5e/v6e
    vmem_limit = (vmem_cap * 3) // 4  # 48 MiB on v7x, 96 MiB on v5e/v6e

    tk = _pick_tk(C_in)
    tm = _pick_tm(dim_out)
    nm = _cdiv(dim_out, tm)
    want_spatial_splits = _cdiv(4, max(B * nm, 1))  # >=4 parallel steps (v7x)
    tn = _pick_tn(HW, tm, tk, itemsize, budget, want_spatial_splits)

    nn = _cdiv(HW, tn)
    nk = _cdiv(C_in, tk)  # tk == C_in or tk | C_in -> every K block is full
    grid = (B, nm, nn, nk)

    in_specs = [
        # streamed activations: (tk, tn) per step (batch dim squeezed)
        pl.BlockSpec((None, tk, tn), lambda b, i, j, k: (b, k, j)),
        # weight slice: constant index over b/j -> DMA'd once per (i, k)
        pl.BlockSpec((tm, tk), lambda b, i, j, k: (i, k)),
        # bias slice (f32)
        pl.BlockSpec((tm, 1), lambda b, i, j, k: (i, 0)),
    ]
    out_spec = pl.BlockSpec((None, tm, tn), lambda b, i, j, k: (b, i, j))

    if nk == 1:
        kernel = _nin_kernel_fused
        scratch = ()
    else:
        kernel = _nin_kernel_acc
        scratch = (pltpu.VMEM((tm, tn), jnp.float32),)

    out3d = pl.pallas_call(
        kernel,
        out_shape=jax.ShapeDtypeStruct((B, dim_out, HW), x_nchw.dtype),
        grid_spec=pltpu.PrefetchScalarGridSpec(
            num_scalar_prefetch=0,
            grid=grid,
            in_specs=in_specs,
            out_specs=out_spec,
            scratch_shapes=scratch,
        ),
        compiler_params=pltpu.CompilerParams(
            # b / m / n independent -> shard across v7x's 2 TCs; reduction (k)
            # last and "arbitrary".  No-op on single-TC v5e/v6e.
            dimension_semantics=("parallel", "parallel", "parallel", "arbitrary"),
            vmem_limit_bytes=vmem_limit,
        ),
    )(x3d, w_eff, b2d)

    # Free reshape back to NCHW -- matches out.permute(0, 3, 1, 2) semantics.
    return out3d.reshape(B, dim_out, H, W)


if __name__ == "__main__":
    key = jax.random.PRNGKey(0)
    k_x, k_v, k_g, k_b = jax.random.split(key, 4)

    B, C_in, H, W = 2, 4, 16, 16
    dim_out = 8

    x = jax.random.normal(k_x, (B, C_in, H, W), dtype=jnp.float32)
    v = jax.random.normal(k_v, (dim_out, C_in), dtype=jnp.float32) * 0.1
    g = jax.random.normal(k_g, (dim_out,), dtype=jnp.float32) * 0.5 + 1.0
    bias = jax.random.normal(k_b, (dim_out,), dtype=jnp.float32) * 0.1

    out = nin_forward(x, v, g, bias)
    out = jax.block_until_ready(out)

    # Pure-JAX reference (same math as the PyTorch module).
    v_norm = jnp.sqrt(jnp.sum(v ** 2, axis=1, keepdims=True))
    w_eff = g[:, None] * v / v_norm
    ref = jnp.einsum("bchw,oc->bohw", x, w_eff) + bias[None, :, None, None]
    assert out.shape == (B, dim_out, H, W)
    assert jnp.allclose(out, ref, atol=1e-4, rtol=1e-4)

    print("KERNEL_OK")
</pallas_src>

<mosaic_0001>
module attributes {stable_mosaic.version = 11 : i64} {
  func.func @_nin_kernel_fused(%arg0: i32, %arg1: i32, %arg2: i32, %arg3: i32, %arg4: memref<1x4x128xf32, #tpu.memory_space<vmem>>, %arg5: memref<8x4xf32, #tpu.memory_space<vmem>>, %arg6: memref<8x1xf32, #tpu.memory_space<vmem>>, %arg7: memref<1x8x128xf32, #tpu.memory_space<vmem>>) attributes {dimension_semantics = [#tpu.dimension_semantics<parallel>, #tpu.dimension_semantics<parallel>, #tpu.dimension_semantics<parallel>, #tpu.dimension_semantics<arbitrary>], iteration_bounds = array<i64: 2, 1, 2, 1>, scalar_prefetch = 0 : i64, scratch_operands = 0 : i64, tpu.core_type = #tpu.core_type<tc>, window_params = [{transform_indices = @transform_0, window_bounds = array<i64: 1, 4, 128>}, {transform_indices = @transform_1, window_bounds = array<i64: 8, 4>}, {transform_indices = @transform_2, window_bounds = array<i64: 8, 1>}, {transform_indices = @transform_3, window_bounds = array<i64: 1, 8, 128>}]} {
    %c0 = arith.constant 0 : index
    %c0_0 = arith.constant 0 : index
    %0 = vector.load %arg5[%c0, %c0_0] : memref<8x4xf32, #tpu.memory_space<vmem>>, vector<8x4xf32>
    %c0_1 = arith.constant 0 : index
    %c0_2 = arith.constant 0 : index
    %c0_3 = arith.constant 0 : index
    %1 = vector.load %arg4[%c0_1, %c0_2, %c0_3] : memref<1x4x128xf32, #tpu.memory_space<vmem>>, vector<1x4x128xf32>
    %2 = vector.shape_cast %1 : vector<1x4x128xf32> to vector<4x128xf32>
    %cst = arith.constant dense<0.000000e+00> : vector<8x128xf32>
    %3 = tpu.matmul %0, %2, %cst {dimension_numbers = #tpu.dot_dimension_numbers<[1], [0], [0], [1], [0, 0, 1, 1], [], []>} : vector<8x4xf32>, vector<4x128xf32>, vector<8x128xf32> -> vector<8x128xf32>
    %c0_4 = arith.constant 0 : index
    %c0_5 = arith.constant 0 : index
    %4 = vector.load %arg6[%c0_4, %c0_5] : memref<8x1xf32, #tpu.memory_space<vmem>>, vector<8x1xf32>
    %5 = vector.broadcast %4 : vector<8x1xf32> to vector<8x128xf32>
    %6 = arith.addf %3, %5 : vector<8x128xf32>
    %c0_6 = arith.constant 0 : index
    %c0_7 = arith.constant 0 : index
    %c0_8 = arith.constant 0 : index
    %7 = vector.load %arg7[%c0_6, %c0_7, %c0_8] : memref<1x8x128xf32, #tpu.memory_space<vmem>>, vector<1x8x128xf32>
    %8 = vector.shape_cast %7 : vector<1x8x128xf32> to vector<8x128xf32>
    %9 = vector.shape_cast %6 : vector<8x128xf32> to vector<1x8x128xf32>
    tpu.vector_store %arg7[%c0_6, %c0_7, %c0_8], %9 {strides = array<i32>} : memref<1x8x128xf32, #tpu.memory_space<vmem>>, vector<1x8x128xf32>,
    return
  }
  func.func @transform_0(%arg0: i32, %arg1: i32, %arg2: i32, %arg3: i32) -> (i32, i32, i32) {
    %c0_i32 = arith.constant 0 : i32
    return %arg0, %arg3, %arg2 : i32, i32, i32
  }
  func.func @transform_1(%arg0: i32, %arg1: i32, %arg2: i32, %arg3: i32) -> (i32, i32) {
    %c0_i32 = arith.constant 0 : i32
    return %arg1, %arg3 : i32, i32
  }
  func.func @transform_2(%arg0: i32, %arg1: i32, %arg2: i32, %arg3: i32) -> (i32, i32) {
    %c0_i32 = arith.constant 0 : i32
    %c0_i32_0 = arith.constant 0 : i32
    return %arg1, %c0_i32 : i32, i32
  }
  func.func @transform_3(%arg0: i32, %arg1: i32, %arg2: i32, %arg3: i32) -> (i32, i32, i32) {
    %c0_i32 = arith.constant 0 : i32
    return %arg0, %arg1, %arg2 : i32, i32, i32
  }
}

</mosaic_0001>

<bundles_post_ra>
// kernel: nin_forward.1
= control target key start
LH: loop header
LB: loop body
LE: loop exit
PB: predicated region body
PF: predicated region fallthrough
CT: control target
= control target key end

     0   :  { %s649_s12 = smov 0   ;;  %s651_s13 = smov 0   ;;  %s706_s0 = inlined_call_operand.vmem [shape: f32[2,4,256], index: 0, kind: input, shape index: {}]   ;;  %s707_s1 = inlined_call_operand.vmem [shape: f32[8,4], index: 1, kind: input, shape index: {}]   ;;  %s708_s2 = inlined_call_operand.vmem [shape: f32[8,1], index: 2, kind: input, shape index: {}]   ;;  %s709_s3 = inlined_call_operand.vmem [shape: f32[2,8,256], index: 3, kind: output, shape index: {}]  }
   0x1   :  { %s653_s14 = smov 0   ;;  %s655_s15 = smov 0  }
   0x2   :  { %s657_s16 = smov 0  }
   0x3 LB: > { %s31_s17 = sadd.s32 1, %s616_s14  ;;  %s39_s18 = sadd.s32 1, %s620_s15  ;;  %s624_s16 = sphi %s657_s16, %s13_s16   ;;  %s620_s15 = sphi %s655_s15, %s713_s15   ;;  %s616_s14 = sphi %s653_s14, %s712_s14   ;;  %s612_s13 = sphi %s651_s13, %s711_s13   ;;  %s608_s12 = sphi %s649_s12, %s710_s12  }
   0x4   : > { %p33_p0 = scmp.ge.s32.totalorder %s31_s17, 2  ;;  %p526_p1 = scmp.ge.s32.totalorder %s624_s16, 1 }
   0x5   : > { %p201_p2 = scmp.lt.s32.totalorder %s624_s16, 5 }
   0x6   : > { %s715_s17 = smov (%p33_p0, %s31_s17), 0  ;;  %s717_s18 = smov (!%p33_p0, %s39_s18), %s620_s15 }
   0x7   : > { %p202_p3 = pnand %p526_p1, %p201_p2  ;;  %p41_p4 = scmp.ge.s32.totalorder %s717_s18, 2 }
   0x8   : > { %p250_p5 = scmp.lt.s32.totalorder (!%p202_p3), %s612_s13, 1  ;;  %p254_p6 = scmp.lt.s32.totalorder (!%p202_p3), %s608_s12, 1 }
   0x9   : > { %s719_s18 = smov (%p41_p4, %s717_s18), 0  ;;  %205 = sbr.rel (%p202_p3) target bundleno = 217 (0xd9), region = 32 }
   0xe   : > { %v626_v0 = vmov 0.0   ;;  %vm627_vm0 = vmmov 0   ;;  %v287_v1 = vld [vmem:[%s708_s2] sm:$0xff]  ;;  %s721_s13 = smov (!%p250_p5, %s612_s13), 1  ;;  %v628_v2 = vmov 0   ;;  %s723_s12 = smov (!%p254_p6, %s608_s12), 1 }
   0xf   : > { %537 = vmatprep.subr.mxu0 %v626_v0  ;;  %539 = vmatprep.mubr.msk.f32.mxu0 %vm627_vm0, %v626_v0  ;;  %s527_s21 = sshll.u32 %s721_s13, 1  ;;  %vm297_vm1 = vcmask 1043456   ;;  %v285_v3 = vld [vmem:[%s707_s1] sm:$0xff]  ;;  %vm293_vm2 = vcmask 31744  }
  0x10   : > { %585 = vset.pattern.permute.xlu0 %v628_v2  ;;  %s259_s22 = sadd.s32 %s527_s21, %s723_s12 }
  0x11   : > { %290 = vperm.xlu0 %585, %v287_v1   ;;  %s528_s23 = sshll.u32 %s259_s22, 2  ;;  %s530_s29 = sshll.u32 %s259_s22, 3 }
  0x12   : > { %s261_s26 = scalar_lea.vmem %s706_s0, %s528_s23  ;;  %s284_s5 = scalar_lea.vmem %s709_s3, %s530_s29 }
  0x13   : > { %v286_v4 = vld [vmem:[%s261_s26] sm:$0xf] }
  0x14   : > { %538 = vmatpush3.msk.msra.mxu0 %vm297_vm1, %v286_v4 }
  0x15   : > { %540 = vmatmul.mubr.msk.f32.vlgmr.msra.gmra.mxu0 %vm293_vm2, %v285_v3 }
  0x8c   : > { %v291_v5 = vpop.permute.xlu0 %290 }
  0xd5   : > { %v367_v6 = vpop.f32.mrf.mxu0 }
  0xd6   : > { %v368_v7 = vadd.f32 %v367_v6, %v291_v5 }
  0xd7   : > { %v541_v8 = vpop.f32.mrf.mxu0 }
  0xd8   : > { %371 = vst [vmem:[%s284_s5] sm:$0xff] %v368_v7 }
  0xd9 PF: > { %s13_s16 = sadd.s32 1, %s624_s16   ;;  %s710_s12 = smov %s616_s14 }
  0xda   : > { %p10_p7 = scmp.ge.s32.totalorder %s13_s16, 6   ;;  %s711_s13 = smov %s620_s15 }
  0xdb   : > { %s712_s14 = smov %s715_s17  ;;  %s713_s15 = smov %s719_s18 }
  0xdc   :  { %12 = sbr.rel (!%p10_p7) target bundleno = 3 (0x3), region = 68 }

</bundles_post_ra>
